<compile_context>
chip_gen: v7x
topology: tpu7x:2x2x1
jax: 0.10.0
libtpu: 0.0.40
codegen_flags: <defaults>
</compile_context>

<pallas_src>
import functools

import jax
import jax.numpy as jnp
from jax.experimental import pallas as pl
from jax.experimental.pallas import tpu as pltpu


def _mha_head_kernel(*refs, scale: float, has_mask: bool):
    """Fused single-head attention for a block of `Bb` batch elements.

    Ref block shapes:
      x_ref    : (Bb, Lq, E)   float32
      kv_ref   : (Bb, Lk, E)   float32
      mask_ref : (Bb, Lq, Lk)  int8   (only when has_mask; nonzero == masked)
      wq_ref   : (E, H)        float32
      wkv_ref  : (E, 2H)       float32  ([Wk | Wv] fused -> one MXU matmul)
      bq_ref   : (1, H)        float32
      bkv_ref  : (1, 2H)       float32  ([bk | bv])
      o_ref    : (Bb, Lq, H)
    """
    if has_mask:
        (x_ref, kv_ref, mask_ref, wq_ref, wkv_ref, bq_ref, bkv_ref, o_ref) = refs
    else:
        (x_ref, kv_ref, wq_ref, wkv_ref, bq_ref, bkv_ref, o_ref) = refs
        mask_ref = None

    f32, bf16 = jnp.float32, jnp.bfloat16

    x = x_ref[...]      # (Bb, Lq, E)
    kv = kv_ref[...]    # (Bb, Lk, E)
    Bb, Lq, E = x.shape
    Lk = kv.shape[1]
    H = wq_ref.shape[1]

    # --- Projections (MXU, bf16 operands, f32 accumulation) ----------------
    # Flatten the batch block so the MXU sees M = Bb*Lq (resp. Bb*Lk) rows
    # instead of one tiny batch element.  K and V share a single (E, 2H)
    # matmul so the MXU N dimension is 2H instead of H.
    x2 = x.reshape(Bb * Lq, E).astype(bf16)
    kv2 = kv.reshape(Bb * Lk, E).astype(bf16)
    wq = wq_ref[...].astype(bf16)
    wkv = wkv_ref[...].astype(bf16)

    q = jnp.dot(x2, wq, preferred_element_type=f32) + bq_ref[...]
    kvp = jnp.dot(kv2, wkv, preferred_element_type=f32) + bkv_ref[...]

    # Fold emb_dim**-0.5 into q (Bb*Lq*H multiplies) instead of scaling the
    # (Lq, Lk) score matrix.
    q = (q * f32(scale)).reshape(Bb, Lq, H)
    k = kvp[:, :H].reshape(Bb, Lk, H)
    v = kvp[:, H:].reshape(Bb, Lk, H)

    # --- Scores + masking ---------------------------------------------------
    s = jnp.einsum("bqh,bkh->bqk", q.astype(bf16), k.astype(bf16),
                   preferred_element_type=f32)
    neg_inf = f32(-jnp.inf)
    if has_mask:
        s = jnp.where(mask_ref[...] != 0, neg_inf, s)

    # --- Numerically-stable softmax -----------------------------------------
    # Fully-masked rows produce all-zero attention, reproducing
    # torch.nan_to_num(softmax(all -inf)) == 0 exactly.
    m = jnp.max(s, axis=-1, keepdims=True)
    m_safe = jnp.where(m == neg_inf, f32(0.0), m)
    p = jnp.exp(s - m_safe)                          # masked entries -> 0.0
    denom = jnp.sum(p, axis=-1, keepdims=True)
    # Deferred normalization: one EUP reciprocal + Bb*Lq*H multiplies after the
    # PV matmul instead of Bb*Lq*Lk VPU divides.  denom==0 (fully masked) is
    # replaced by 1.0 so 0 * inv stays exactly 0.
    inv = pl.reciprocal(jnp.where(denom == 0.0, f32(1.0), denom), approx=True)

    # TODO(synk): training-mode dropout on the attention matrix
    # (pltpu.prng_seed + pltpu.stateful_bernoulli); identity in eval mode.

    out = jnp.einsum("bqk,bkh->bqh", p.astype(bf16), v.astype(bf16),
                     preferred_element_type=f32) * inv
    o_ref[...] = out.astype(o_ref.dtype)


def _pick_batch_block(B, Lq, Lk, E, H, has_mask, target_rows=256,
                      vmem_budget=24 * 2**20):
    """Largest divisor of B such that Bblk*Lq reaches the MXU-M target while
    the per-step blocks + f32 intermediates stay within a conservative VMEM
    budget (valid on v7x's 64 MiB as well as v5e/v6e's 128 MiB)."""
    bblk = max(1, min(B, max(1, target_rows // max(Lq, 1))))

    def step_bytes(b):
        per = b * (Lq * E + Lk * E + Lq * H) * 4            # x, kv, out blocks
        if has_mask:
            per += b * Lq * Lk                               # int8 mask block
        per += b * (2 * Lq * Lk + (Lq + 2 * Lk) * H) * 4     # scores/p + q/k/v
        return 2 * per                                       # double buffering

    while bblk > 1 and step_bytes(bblk) > vmem_budget:
        bblk -= 1
    while B % bblk != 0:                                     # exact grid cover
        bblk -= 1
    return bblk


def mha_head_forward(x, wq, bq, wk, bk, wv, bv,
                     enc_x=None, attention_mask=None):
    """Forward pass of MHAHead (eval mode).

    x              : (B, Lq, E) float32
    wq/wk/wv       : (E, H) float32   (torch Linear.weight transposed)
    bq/bk/bv       : (H,)   float32
    enc_x          : optional (B, Lk, E) for cross-attention
    attention_mask : optional, broadcastable to (B, Lq, Lk); entries > 0 masked.
    Returns (B, Lq, H) in x.dtype.
    """
    B, Lq, E = x.shape
    kv = x if enc_x is None else enc_x
    Lk = kv.shape[1]
    H = wq.shape[1]
    has_mask = attention_mask is not None

    # Fuse K/V projection weights -> single (E, 2H) MXU matmul over kv.
    wkv = jnp.concatenate([wk, wv], axis=1).astype(jnp.float32)           # (E, 2H)
    bkv = jnp.concatenate([bk, bv]).reshape(1, 2 * H).astype(jnp.float32)
    bq2 = bq.reshape(1, H).astype(jnp.float32)

    bblk = _pick_batch_block(B, Lq, Lk, E, H, has_mask)
    grid = (B // bblk,)

    in_specs = [
        pl.BlockSpec((bblk, Lq, E), lambda b: (b, 0, 0)),    # x
        pl.BlockSpec((bblk, Lk, E), lambda b: (b, 0, 0)),    # kv (x or enc_x)
    ]
    args = [x, kv]
    if has_mask:
        # int8 mask (4x less HBM/VMEM than f32).  When attention_mask is None
        # the mask input is dropped entirely (mask-free kernel variant).
        mask = (jnp.broadcast_to(attention_mask, (B, Lq, Lk)) > 0).astype(jnp.int8)
        in_specs.append(pl.BlockSpec((bblk, Lq, Lk), lambda b: (b, 0, 0)))
        args.append(mask)

    # Weights/biases map to block (0, 0) on every grid step, so the pipeline
    # fetches them once and never re-DMAs them.
    in_specs += [
        pl.BlockSpec((E, H), lambda b: (0, 0)),              # Wq
        pl.BlockSpec((E, 2 * H), lambda b: (0, 0)),          # [Wk | Wv]
        pl.BlockSpec((1, H), lambda b: (0, 0)),              # bq
        pl.BlockSpec((1, 2 * H), lambda b: (0, 0)),          # [bk | bv]
    ]
    args += [wq, wkv, bq2, bkv]

    # Explicit scoped-VMEM limit sized to the actual block footprint
    # (defaults are 16/32 MiB; cap at 64 MiB so the bound is valid on v7x).
    per_step = bblk * (Lq * E + Lk * E + Lq * H) * 4
    if has_mask:
        per_step += bblk * Lq * Lk
    scratch_est = bblk * (2 * Lq * Lk + (Lq + 2 * Lk) * H) * 4
    weight_bytes = (E * H + E * 2 * H + 3 * H) * 4
    vmem_limit = int(min(64 * 2**20,
                         max(32 * 2**20,
                             2 * (2 * per_step + 2 * weight_bytes + scratch_est))))

    kernel = functools.partial(_mha_head_kernel, scale=float(E) ** -0.5,
                               has_mask=has_mask)

    # TODO(synk): for long sequences whose (Lq, Lk) blocks no longer fit v7x's
    # 64 MiB VMEM, switch to a flash-style online-softmax with an extra
    # "arbitrary" Lk grid axis; unnecessary at these block sizes.
    # TODO(synk): lane-dense (>=128) output / MXU-N would require fusing
    # several heads per launch, which is outside a single MHAHead's interface.
    return pl.pallas_call(
        kernel,
        out_shape=jax.ShapeDtypeStruct((B, Lq, H), x.dtype),
        grid=grid,
        in_specs=in_specs,
        out_specs=pl.BlockSpec((bblk, Lq, H), lambda b: (b, 0, 0)),
        compiler_params=pltpu.CompilerParams(
            dimension_semantics=("parallel",),                # v7x: 2 TCs share grid
            vmem_limit_bytes=vmem_limit),
    )(*args)


def _reference(x, wq, bq, wk, bk, wv, bv, enc_x=None, attention_mask=None):
    """Pure-JAX reference mirroring the PyTorch forward (HIGHEST precision)."""
    E = x.shape[-1]
    kv = x if enc_x is None else enc_x
    hp = jax.lax.Precision.HIGHEST
    q = jnp.einsum("ble,eh->blh", x, wq, precision=hp) + bq
    k = jnp.einsum("ble,eh->blh", kv, wk, precision=hp) + bk
    v = jnp.einsum("ble,eh->blh", kv, wv, precision=hp) + bv
    s = jnp.einsum("bqh,bkh->bqk", q, k, precision=hp) * (float(E) ** -0.5)
    if attention_mask is not None:
        s = jnp.where(attention_mask > 0, -jnp.inf, s)
    m = jnp.max(s, axis=-1, keepdims=True)
    e = jnp.exp(s - m)
    attn = e / jnp.sum(e, axis=-1, keepdims=True)
    attn = jnp.nan_to_num(attn)   # fully-masked rows -> 0, like torch.nan_to_num
    return jnp.einsum("bqk,bkh->bqh", attn, v, precision=hp)


if __name__ == "__main__":
    key = jax.random.PRNGKey(0)
    batch, seq, emb_dim, head_dim = 2, 8, 32, 16

    k_x, k_e, k_wq, k_wk, k_wv, k_bq, k_bk, k_bv = jax.random.split(key, 8)
    w_scale = 1.0 / (emb_dim ** 0.5)
    x = jax.random.normal(k_x, (batch, seq, emb_dim), dtype=jnp.float32)
    enc_x = jax.random.normal(k_e, (batch, seq, emb_dim), dtype=jnp.float32)
    wq = jax.random.normal(k_wq, (emb_dim, head_dim), jnp.float32) * w_scale
    wk = jax.random.normal(k_wk, (emb_dim, head_dim), jnp.float32) * w_scale
    wv = jax.random.normal(k_wv, (emb_dim, head_dim), jnp.float32) * w_scale
    bq = jax.random.normal(k_bq, (head_dim,), jnp.float32) * 0.1
    bk = jax.random.normal(k_bk, (head_dim,), jnp.float32) * 0.1
    bv = jax.random.normal(k_bv, (head_dim,), jnp.float32) * 0.1

    # Causal mask (>0 == masked) with one fully-masked query row to exercise
    # the nan_to_num(softmax) -> 0 path.
    causal = (jnp.arange(seq)[None, :] > jnp.arange(seq)[:, None]).astype(jnp.float32)
    mask = jnp.broadcast_to(causal, (batch, seq, seq))
    mask = mask.at[:, 3, :].set(1.0)

    out_plain = mha_head_forward(x, wq, bq, wk, bk, wv, bv)
    out_masked = mha_head_forward(x, wq, bq, wk, bk, wv, bv, attention_mask=mask)
    out_cross = mha_head_forward(x, wq, bq, wk, bk, wv, bv, enc_x=enc_x)
    jax.block_until_ready((out_plain, out_masked, out_cross))

    ref_plain = _reference(x, wq, bq, wk, bk, wv, bv)
    ref_masked = _reference(x, wq, bq, wk, bk, wv, bv, attention_mask=mask)
    ref_cross = _reference(x, wq, bq, wk, bk, wv, bv, enc_x=enc_x)

    assert out_plain.shape == (batch, seq, head_dim), out_plain.shape
    assert out_plain.dtype == jnp.float32
    # Tolerance accounts for bf16 MXU operands (per perf review) + approx
    # reciprocal vs the HIGHEST-precision f32 XLA reference path.
    tol = dict(atol=5e-2, rtol=5e-2)
    assert jnp.allclose(out_plain, ref_plain, **tol), "mismatch (no mask)"
    assert jnp.allclose(out_masked, ref_masked, **tol), "mismatch (masked)"
    assert jnp.allclose(out_cross, ref_cross, **tol), "mismatch (cross-attn)"
    # Fully-masked query row must be exactly zero (torch.nan_to_num semantics).
    assert jnp.all(out_masked[:, 3, :] == 0.0), "fully-masked row not zeroed"

    print("KERNEL_OK")
</pallas_src>

<mosaic_0001>
module attributes {stable_mosaic.version = 11 : i64} {
  func.func @_mha_head_kernel(%arg0: i32, %arg1: memref<2x8x32xf32, #tpu.memory_space<vmem>>, %arg2: memref<2x8x32xf32, #tpu.memory_space<vmem>>, %arg3: memref<32x16xf32, #tpu.memory_space<vmem>>, %arg4: memref<32x32xf32, #tpu.memory_space<vmem>>, %arg5: memref<1x16xf32, #tpu.memory_space<vmem>>, %arg6: memref<1x32xf32, #tpu.memory_space<vmem>>, %arg7: memref<2x8x16xf32, #tpu.memory_space<vmem>>) attributes {dimension_semantics = [#tpu.dimension_semantics<parallel>], iteration_bounds = array<i64: 1>, scalar_prefetch = 0 : i64, scratch_operands = 0 : i64, tpu.core_type = #tpu.core_type<tc>, window_params = [{transform_indices = @transform_0, window_bounds = array<i64: 2, 8, 32>}, {transform_indices = @transform_1, window_bounds = array<i64: 2, 8, 32>}, {pipeline_mode = #tpu.pipeline_mode<synchronous>, transform_indices = @transform_2, window_bounds = array<i64: 32, 16>}, {pipeline_mode = #tpu.pipeline_mode<synchronous>, transform_indices = @transform_3, window_bounds = array<i64: 32, 32>}, {pipeline_mode = #tpu.pipeline_mode<synchronous>, transform_indices = @transform_4, window_bounds = array<i64: 1, 16>}, {pipeline_mode = #tpu.pipeline_mode<synchronous>, transform_indices = @transform_5, window_bounds = array<i64: 1, 32>}, {transform_indices = @transform_6, window_bounds = array<i64: 2, 8, 16>}]} {
    %c0 = arith.constant 0 : index
    %c0_0 = arith.constant 0 : index
    %c0_1 = arith.constant 0 : index
    %0 = vector.load %arg1[%c0, %c0_0, %c0_1] : memref<2x8x32xf32, #tpu.memory_space<vmem>>, vector<2x8x32xf32>
    %c0_2 = arith.constant 0 : index
    %c0_3 = arith.constant 0 : index
    %c0_4 = arith.constant 0 : index
    %1 = vector.load %arg2[%c0_2, %c0_3, %c0_4] : memref<2x8x32xf32, #tpu.memory_space<vmem>>, vector<2x8x32xf32>
    %2 = vector.shape_cast %0 : vector<2x8x32xf32> to vector<16x32xf32>
    %3 = arith.truncf %2 : vector<16x32xf32> to vector<16x32xbf16>
    %4 = vector.shape_cast %1 : vector<2x8x32xf32> to vector<16x32xf32>
    %5 = arith.truncf %4 : vector<16x32xf32> to vector<16x32xbf16>
    %c0_5 = arith.constant 0 : index
    %c0_6 = arith.constant 0 : index
    %6 = vector.load %arg3[%c0_5, %c0_6] : memref<32x16xf32, #tpu.memory_space<vmem>>, vector<32x16xf32>
    %7 = arith.truncf %6 : vector<32x16xf32> to vector<32x16xbf16>
    %c0_7 = arith.constant 0 : index
    %c0_8 = arith.constant 0 : index
    %8 = vector.load %arg4[%c0_7, %c0_8] : memref<32x32xf32, #tpu.memory_space<vmem>>, vector<32x32xf32>
    %9 = arith.truncf %8 : vector<32x32xf32> to vector<32x32xbf16>
    %cst = arith.constant dense<0.000000e+00> : vector<16x16xf32>
    %10 = tpu.matmul %3, %7, %cst {dimension_numbers = #tpu.dot_dimension_numbers<[1], [0], [0], [1], [0, 0, 1, 1], [], []>} : vector<16x32xbf16>, vector<32x16xbf16>, vector<16x16xf32> -> vector<16x16xf32>
    %c0_9 = arith.constant 0 : index
    %c0_10 = arith.constant 0 : index
    %11 = vector.load %arg5[%c0_9, %c0_10] : memref<1x16xf32, #tpu.memory_space<vmem>>, vector<1x16xf32>
    %12 = vector.broadcast %11 : vector<1x16xf32> to vector<16x16xf32>
    %13 = arith.addf %10, %12 : vector<16x16xf32>
    %cst_11 = arith.constant dense<0.000000e+00> : vector<16x32xf32>
    %14 = tpu.matmul %5, %9, %cst_11 {dimension_numbers = #tpu.dot_dimension_numbers<[1], [0], [0], [1], [0, 0, 1, 1], [], []>} : vector<16x32xbf16>, vector<32x32xbf16>, vector<16x32xf32> -> vector<16x32xf32>
    %c0_12 = arith.constant 0 : index
    %c0_13 = arith.constant 0 : index
    %15 = vector.load %arg6[%c0_12, %c0_13] : memref<1x32xf32, #tpu.memory_space<vmem>>, vector<1x32xf32>
    %16 = vector.broadcast %15 : vector<1x32xf32> to vector<16x32xf32>
    %17 = arith.addf %14, %16 : vector<16x32xf32>
    %cst_14 = arith.constant 0.176776692 : f32
    %18 = vector.broadcast %cst_14 : f32 to vector<16x16xf32>
    %19 = arith.mulf %13, %18 : vector<16x16xf32>
    %20 = vector.shape_cast %19 : vector<16x16xf32> to vector<2x8x16xf32>
    %21 = vector.extract_strided_slice %17 {offsets = [0, 0], sizes = [16, 16], strides = [1, 1]} : vector<16x32xf32> to vector<16x16xf32>
    %22 = vector.shape_cast %21 : vector<16x16xf32> to vector<2x8x16xf32>
    %23 = vector.extract_strided_slice %17 {offsets = [0, 16], sizes = [16, 16], strides = [1, 1]} : vector<16x32xf32> to vector<16x16xf32>
    %24 = vector.shape_cast %23 : vector<16x16xf32> to vector<2x8x16xf32>
    %25 = arith.truncf %20 : vector<2x8x16xf32> to vector<2x8x16xbf16>
    %26 = arith.truncf %22 : vector<2x8x16xf32> to vector<2x8x16xbf16>
    "tpu.trace_start"() <{level = 10 : i32, message = "bqh,bkh->bqk"}> : () -> ()
    %cst_15 = arith.constant dense<0.000000e+00> : vector<2x8x8xf32>
    %27 = tpu.matmul %25, %26, %cst_15 {dimension_numbers = #tpu.dot_dimension_numbers<[2], [2], [1], [1], [0, 0, 0, 1, 1, 1], [0], [0]>} : vector<2x8x16xbf16>, vector<2x8x16xbf16>, vector<2x8x8xf32> -> vector<2x8x8xf32>
    "tpu.trace_stop"() : () -> ()
    %cst_16 = arith.constant dense<0xFF800000> : vector<2x8xf32>
    %28 = vector.multi_reduction <maximumf>, %27, %cst_16 [2] : vector<2x8x8xf32> to vector<2x8xf32>
    %29 = vector.shape_cast %28 : vector<2x8xf32> to vector<2x8x1xf32>
    %cst_17 = arith.constant 0xFF800000 : f32
    %30 = vector.broadcast %cst_17 : f32 to vector<2x8x1xf32>
    %31 = arith.cmpf oeq, %29, %30 : vector<2x8x1xf32>
    %cst_18 = arith.constant 0.000000e+00 : f32
    %32 = vector.broadcast %cst_18 : f32 to vector<2x8x1xf32>
    %33 = arith.select %31, %32, %29 : vector<2x8x1xi1>, vector<2x8x1xf32>
    %34 = vector.broadcast %33 : vector<2x8x1xf32> to vector<2x8x8xf32>
    %35 = arith.subf %27, %34 : vector<2x8x8xf32>
    %36 = math.exp %35 : vector<2x8x8xf32>
    %cst_19 = arith.constant dense<0.000000e+00> : vector<2x8xf32>
    %37 = vector.multi_reduction <add>, %36, %cst_19 [2] : vector<2x8x8xf32> to vector<2x8xf32>
    %38 = vector.shape_cast %37 : vector<2x8xf32> to vector<2x8x1xf32>
    %cst_20 = arith.constant 0.000000e+00 : f32
    %39 = vector.broadcast %cst_20 : f32 to vector<2x8x1xf32>
    %40 = arith.cmpf oeq, %38, %39 : vector<2x8x1xf32>
    %cst_21 = arith.constant 1.000000e+00 : f32
    %41 = vector.broadcast %cst_21 : f32 to vector<2x8x1xf32>
    %42 = arith.select %40, %41, %38 : vector<2x8x1xi1>, vector<2x8x1xf32>
    %43 = tpu.reciprocal %42 {approx = true} : vector<2x8x1xf32> -> vector<2x8x1xf32>
    %44 = arith.truncf %36 : vector<2x8x8xf32> to vector<2x8x8xbf16>
    %45 = arith.truncf %24 : vector<2x8x16xf32> to vector<2x8x16xbf16>
    "tpu.trace_start"() <{level = 10 : i32, message = "bqk,bkh->bqh"}> : () -> ()
    %cst_22 = arith.constant dense<0.000000e+00> : vector<2x8x16xf32>
    %46 = tpu.matmul %44, %45, %cst_22 {dimension_numbers = #tpu.dot_dimension_numbers<[2], [1], [1], [2], [0, 0, 0, 1, 1, 2], [0], [0]>} : vector<2x8x8xbf16>, vector<2x8x16xbf16>, vector<2x8x16xf32> -> vector<2x8x16xf32>
    "tpu.trace_stop"() : () -> ()
    %47 = vector.broadcast %43 : vector<2x8x1xf32> to vector<2x8x16xf32>
    %48 = arith.mulf %46, %47 : vector<2x8x16xf32>
    %c0_23 = arith.constant 0 : index
    %c0_24 = arith.constant 0 : index
    %c0_25 = arith.constant 0 : index
    %49 = vector.load %arg7[%c0_23, %c0_24, %c0_25] : memref<2x8x16xf32, #tpu.memory_space<vmem>>, vector<2x8x16xf32>
    tpu.vector_store %arg7[%c0_23, %c0_24, %c0_25], %48 {strides = array<i32>} : memref<2x8x16xf32, #tpu.memory_space<vmem>>, vector<2x8x16xf32>,
    return
  }
  func.func @transform_0(%arg0: i32) -> (i32, i32, i32) {
    %c0_i32 = arith.constant 0 : i32
    %c0_i32_0 = arith.constant 0 : i32
    %c0_i32_1 = arith.constant 0 : i32
    return %arg0, %c0_i32, %c0_i32_0 : i32, i32, i32
  }
  func.func @transform_1(%arg0: i32) -> (i32, i32, i32) {
    %c0_i32 = arith.constant 0 : i32
    %c0_i32_0 = arith.constant 0 : i32
    %c0_i32_1 = arith.constant 0 : i32
    return %arg0, %c0_i32, %c0_i32_0 : i32, i32, i32
  }
  func.func @transform_2(%arg0: i32) -> (i32, i32) {
    %c0_i32 = arith.constant 0 : i32
    %c0_i32_0 = arith.constant 0 : i32
    %c0_i32_1 = arith.constant 0 : i32
    return %c0_i32, %c0_i32_0 : i32, i32
  }
  func.func @transform_3(%arg0: i32) -> (i32, i32) {
    %c0_i32 = arith.constant 0 : i32
    %c0_i32_0 = arith.constant 0 : i32
    %c0_i32_1 = arith.constant 0 : i32
    return %c0_i32, %c0_i32_0 : i32, i32
  }
  func.func @transform_4(%arg0: i32) -> (i32, i32) {
    %c0_i32 = arith.constant 0 : i32
    %c0_i32_0 = arith.constant 0 : i32
    %c0_i32_1 = arith.constant 0 : i32
    return %c0_i32, %c0_i32_0 : i32, i32
  }
  func.func @transform_5(%arg0: i32) -> (i32, i32) {
    %c0_i32 = arith.constant 0 : i32
    %c0_i32_0 = arith.constant 0 : i32
    %c0_i32_1 = arith.constant 0 : i32
    return %c0_i32, %c0_i32_0 : i32, i32
  }
  func.func @transform_6(%arg0: i32) -> (i32, i32, i32) {
    %c0_i32 = arith.constant 0 : i32
    %c0_i32_0 = arith.constant 0 : i32
    %c0_i32_1 = arith.constant 0 : i32
    return %arg0, %c0_i32, %c0_i32_0 : i32, i32, i32
  }
}

</mosaic_0001>

<bundles_post_ra>
// kernel: tpu_custom_call.1
= control target key start
LH: loop header
LB: loop body
LE: loop exit
PB: predicated region body
PF: predicated region fallthrough
CT: control target
= control target key end

     0   :  { %11 = vsyncpa [#allocation3], 0  ;;  %s675_s0 = inlined_call_operand.vmem [shape: f32[2,8,32], index: 0, kind: input, shape index: {}]   ;;  %s676_s1 = inlined_call_operand.hbm [shape: f32[2,8,32], index: 1, kind: input, shape index: {}]   ;;  %s677_s2 = inlined_call_operand.vmem [shape: f32[32,16], index: 2, kind: input, shape index: {}]   ;;  %s678_s3 = inlined_call_operand.vmem [shape: f32[32,32], index: 3, kind: input, shape index: {}]   ;;  %s679_s4 = inlined_call_operand.vmem [shape: f32[1,16], index: 4, kind: input, shape index: {}]   ;;  %s680_s5 = inlined_call_operand.vmem [shape: f32[1,32], index: 5, kind: input, shape index: {}]   ;;  %s681_s6 = inlined_call_operand.hbm [shape: f32[2,8,16], index: 6, kind: output, shape index: {}]  }
   0x1   :  { %12 = vsyncpa [#allocation4], 0  ;;  %s535_s21 = smov [#allocation2]   ;;  %s487_s25 = scalar_lea.hbm %s676_s1, 256 }
   0x2   :  { %s20_s22 = sshll.u32 %s535_s21, 4  ;;  %p488_p0 = scmp.ne.s32.totalorder %s676_s1, %s487_s25  ;;  %s21_s22 = int_to_ptr.vmem [resolvable:$true] %s20_s22 }
   0x3   :  { %p491_p1 = scmp.lt.u32.totalorder %s487_s25, %s676_s1 }
   0x5   :  { %p493_p2 = pnand %p491_p1, %p488_p0 }
   0x7   :  { %496 = shalt.err (!%p493_p2)
}
   0x8   :  { %s497_s30 = scalar_lea.vmem %s21_s22, 256  ;;  %p502_p4 = scmp.lt.s32.totalorder %s21_s22, %s21_s22 }
   0x9   :  { %p498_p3 = scmp.ne.s32.totalorder %s21_s22, %s497_s30  ;;  %p503_p5 = scmp.lt.s32.totalorder %s497_s30, %s497_s30 }
   0xb   :  { %p504_p6 = por %p503_p5, %p502_p4 }
   0xd   :  { %p505_p7 = pnand %p504_p6, %p498_p3 }
   0xf   :  { %508 = shalt.err (!%p505_p7)
}
  0x10   :  { %s536_s7 = smov 128   ;;  %s537_s8 = smov 8  }
  0x11   :  { %26 = dma.hbm_to_vmem [thread:$0]  %s676_s1, 256, %s21_s22, [#allocation3], %s536_s7, %s536_s7, %s537_s8  }
  0x12   :  { %531 = dma.done.wait [#allocation3], 256  }
  0x13   :  { %532 = vsyncadd [#allocation3], 4294967040  ;;  %v538_v0 = vmov 0.0   ;;  %vm539_vm0 = vmmov 0   ;;  %v51_v1 = vld [vmem:[%s678_s3] sm:$0xff]  ;;  %v52_v2 = vld [vmem:[%s678_s3 + $0x8] sm:$0xff] }
  0x14   :  { %440 = vmatprep.subr.bf16.mxu1 %v538_v0  ;;  %432 = vmatprep.subr.bf16.mxu0 %v538_v0  ;;  %v45_v3 = vld [vmem:[%s677_s2] sm:$0xff]  ;;  %v55_v4 = vpack.c.bf16 %v52_v2, %v51_v1  ;;  %v46_v5 = vld [vmem:[%s677_s2 + $0x8] sm:$0xff]  ;;  %v53_v6 = vld [vmem:[%s678_s3 + $0x10] sm:$0xff]  ;;  %vm64_vm1 = vcmask 261120   ;;  %vm166_vm2 = vcmask 130048   ;;  %vm296_vm3 = vcmask 1043456  }
  0x15   :  { %444 = vmatprep.mubr.msk.bf16.mxu1 %vm539_vm0, %v538_v0  ;;  %436 = vmatprep.mubr.msk.bf16.mxu0 %vm539_vm0, %v538_v0  ;;  %v54_v7 = vld [vmem:[%s678_s3 + $0x18] sm:$0xff]  ;;  %v49_v8 = vpack.c.bf16 %v46_v5, %v45_v3  ;;  %v47_v9 = vld [vmem:[%s677_s2 + $0x10] sm:$0xff]  ;;  %v41_v11 = vld [vmem:[#allocation2] sm:$0xff]  ;;  %vm259_vm4 = vcmask 64512  }
  0x16   :  { %441 = vmatpush3.bf16.msra.mxu1 %v55_v4  ;;  %v56_v10 = vpack.c.bf16 %v54_v7, %v53_v6  ;;  %v42_v12 = vld [vmem:[#allocation2 + $0x8] sm:$0xff]  ;;  %v48_v13 = vld [vmem:[%s677_s2 + $0x18] sm:$0xff]  ;;  %v39_v15 = vld [vmem:[%s675_s0] sm:$0xff] }
  0x17   :  { %442 = vmatprep.subr.bf16.mxu1 %v538_v0  ;;  %433 = vmatpush3.bf16.msra.mxu0 %v49_v8  ;;  %v50_v14 = vpack.c.bf16 %v48_v13, %v47_v9  ;;  %v40_v16 = vld [vmem:[%s675_s0 + $0x8] sm:$0xff]  ;;  %v44_v17 = vpack.c.bf16 %v42_v12, %v41_v11  ;;  %v412_v19 = vld [vmem:[%s680_s5] ss:$0 sm:$0xff]  ;;  %s540_s5 = smov 112  }
  0x18   :  { %434 = vmatprep.subr.bf16.mxu0 %v538_v0  ;;  %v43_v18 = vpack.c.bf16 %v40_v16, %v39_v15  ;;  %v410_v20 = vld [vmem:[%s679_s4] ss:$0 sm:$0xff]  ;;  %s541_s4 = smov [#allocation5]  }
  0x19   :  { %s398_s9 = sshll.u32 %s541_s4, 4  ;;  %s399_s9 = int_to_ptr.vmem [resolvable:$true] %s398_s9 }
  0x1a   :  { %443 = vmatpush3.bf16.msra.mxu1 %v56_v10  ;;  %s509_s10 = scalar_lea.vmem %s399_s9, 256  ;;  %p514_p9 = scmp.lt.s32.totalorder %s399_s9, %s399_s9 }
  0x1b   :  { %435 = vmatpush3.bf16.msra.mxu0 %v50_v14  ;;  %454 = vmatprep.subr.bf16.mxu1 %v538_v0  ;;  %p510_p8 = scmp.ne.s32.totalorder %s399_s9, %s509_s10  ;;  %p515_p10 = scmp.lt.s32.totalorder %s509_s10, %s509_s10 }
  0x1c   :  { %448 = vmatprep.subr.bf16.mxu0 %v538_v0 }
  0x1d   :  { %445 = vmatmul.mubr.msk.bf16.vlgmr.msra.gmra.mrb[0].mxu1 %vm64_vm1, %v44_v17  ;;  %p516_p11 = por %p515_p10, %p514_p9 }
  0x1e   :  { %437 = vmatmul.mubr.msk.bf16.vlgmr.msra.gmra.mrb[0].mxu0 %vm64_vm1, %v43_v18  ;;  %456 = vmatprep.mubr.msk.bf16.mxu1 %vm539_vm0, %v538_v0 }
  0x1f   :  { %450 = vmatprep.mubr.msk.bf16.mxu0 %vm539_vm0, %v538_v0  ;;  %p517_p12 = pnand %p516_p11, %p510_p8 }
  0xf0   :  { %v153_v21 = vpop.f32.mrb[0].mxu1 }
  0xf1   :  { %v154_v22 = vadd.f32 %v412_v19, %v153_v21  ;;  %v446_v23 = vpop.f32.mrb[1].mxu1  ;;  %v102_v24 = vpop.f32.mrb[0].mxu0 }
  0xf2   :  { %v156_v25 = vpop.f32.mrb[2].mxu1  ;;  %v103_v26 = vadd.f32 %v410_v20, %v102_v24  ;;  %v438_v27 = vpop.f32.mrb[1].mxu0 }
  0xf3   :  { %v164_v28 = vpack.c.bf16 %v154_v22, %v154_v22  ;;  %v157_v29 = vadd.f32 %v412_v19, %v156_v25  ;;  %v447_v30 = vpop.f32.mrb[3].mxu1  ;;  %v105_v31 = vpop.f32.mrb[2].mxu0 }
  0xf4   :  { %v439_v32 = vpop.f32.mrb[3].mxu0  ;;  %v160_v35 = vmul.f32 0.17677669, %v103_v26  ;;  %v106_v36 = vadd.f32 %v410_v20, %v105_v31 }
  0xf5   :  { %v171_v33 = vsel %vm166_vm2, %v164_v28, 0  ;;  %v165_v34 = vpack.c.bf16 %v157_v29, %v157_v29  ;;  %291 = vrot.lane.b32.xlu1 %v164_v28, %s540_s5 }
  0xf6   :  { %449 = vmatpush3.bf16.xpose.msra.mxu0 %v171_v33  ;;  %v162_v38 = vpack.c.bf16 %v160_v35, %v160_v35  ;;  %v161_v39 = vmul.f32 0.17677669, %v106_v36 }
  0xf7   :  { %v217_v37 = vsel %vm166_vm2, %v165_v34, 0  ;;  %460 = vmatprep.subr.bf16.mxu0 %v538_v0 }
  0xf8   :  { %455 = vmatpush3.bf16.xpose.msra.mxu1 %v217_v37  ;;  %v163_v40 = vpack.c.bf16 %v161_v39, %v161_v39 }
  0xf9   :  { %341 = vrot.lane.b32.xlu1 %v165_v34, %s540_s5  ;;  %466 = vmatprep.subr.bf16.mxu1 %v538_v0 }
  0xfd   :  { %451 = vmatmul.mubr.msk.bf16.vlgmr.msra.gmra.mrb[4].mxu0 %vm166_vm2, %v162_v38 }
  0xfe   :  { %462 = vmatprep.mubr.msk.bf16.mxu0 %vm539_vm0, %v538_v0 }
  0xff   :  { %457 = vmatmul.mubr.msk.bf16.vlgmr.msra.gmra.mrb[4].mxu1 %vm166_vm2, %v163_v40 }
 0x100   :  { %468 = vmatprep.mubr.msk.bf16.mxu1 %vm539_vm0, %v538_v0 }
 0x167   :  { %v292_v41 = vpop.permute.xlu1 %291 }
 0x168   :  { %v298_v42 = vsel %vm296_vm3, %v292_v41, 0 }
 0x169   :  { %461 = vmatpush3.bf16.msra.mxu0 %v298_v42 }
 0x16b   :  { %v342_v43 = vpop.permute.xlu1 %341 }
 0x16c   :  { %v347_v44 = vsel %vm296_vm3, %v342_v43, 0 }
 0x16d   :  { %467 = vmatpush3.bf16.msra.mxu1 %v347_v44 }
 0x1d0   :  { %v207_v45 = vpop.f32.mrb[4].mxu0 }
 0x1d1   :  { %v452_v46 = vpop.f32.mrb[5].mxu0  ;;  %v260_v47 = vsel %vm259_vm4, %v207_v45, -inf }
 0x1d2   :  { %v253_v48 = vpop.f32.mrb[4].mxu1  ;;  %261 = vmax.xlane.f32.xlu0 %v260_v47  ;;  %v210_v49 = vpop.f32.mrb[6].mxu0 }
 0x1d3   :  { %v453_v50 = vpop.f32.mrb[7].mxu0  ;;  %v458_v51 = vpop.f32.mrb[5].mxu1  ;;  %v263_v54 = vsel %vm259_vm4, %v253_v48, -inf }
 0x1d4   :  { %v256_v52 = vpop.f32.mrb[6].mxu1 }
 0x1d5   :  { %v459_v53 = vpop.f32.mrb[7].mxu1 }
 0x1d6   :  { %264 = vmax.xlane.f32.xlu0 %v263_v54 }
 0x25f   :  { %v262_v55 = vpop.xlane.xlu0 %261 }
 0x260   :  { %vm266_vm5 = vcmp.eq.f32.partialorder %v262_v55, -inf }
 0x261   :  { %v268_v56 = vsel %vm266_vm5, 0.0, %v262_v55 }
 0x262   :  { %v270_v57 = vsub.f32 %v207_v45, %v268_v56 }
 0x263   :  { %v265_v58 = vpop.xlane.xlu0 %264 }
 0x264   :  { %v272_v59 = vmul.f32 1.442695, %v270_v57  ;;  %vm267_vm6 = vcmp.eq.f32.partialorder %v265_v58, -inf }
 0x265   :  { %v269_v60 = vsel %vm267_vm6, 0.0, %v265_v58 }
 0x266   :  { %479 = vpow2.f32 %v272_v59  ;;  %v271_v61 = vsub.f32 %v253_v48, %v269_v60 }
 0x268   :  { %v274_v62 = vmul.f32 1.442695, %v271_v61 }
 0x26a   :  { %481 = vpow2.f32 %v274_v62 }
 0x270   :  { %v480_v63 = vpop.eup %479 }
 0x271   :  { %v276_v0 = vsel %vm259_vm4, %v480_v63, 0.0  ;;  %v288_v1 = vpack.c.bf16 %v480_v63, %v480_v63 }
 0x272   :  { %277 = vadd.xlane.f32.xlu0 %v276_v0 }
 0x273   :  { %463 = vmatmul.mubr.msk.bf16.vlgmr.msra.gmra.mrb[8].mxu0 %vm259_vm4, %v288_v1 }
 0x274   :  { %v482_v2 = vpop.eup %481 }
 0x275   :  { %v279_v3 = vsel %vm259_vm4, %v482_v2, 0.0  ;;  %v289_v4 = vpack.c.bf16 %v482_v2, %v482_v2 }
 0x276   :  { %280 = vadd.xlane.f32.xlu1 %v279_v3 }
 0x277   :  { %469 = vmatmul.mubr.msk.bf16.vlgmr.msra.gmra.mrb[8].mxu1 %vm259_vm4, %v289_v4 }
 0x2ff   :  { %v278_v5 = vpop.xlane.xlu0 %277 }
 0x300   :  { %vm282_vm7 = vcmp.eq.f32.partialorder %v278_v5, 0.0 }
 0x301   :  { %v284_v7 = vsel %vm282_vm7, 1.0, %v278_v5 }
 0x302   :  { %483 = vrcp.f32 %v284_v7 }
 0x303   :  { %v281_v6 = vpop.xlane.xlu1 %280 }
 0x304   :  { %vm283_vm8 = vcmp.eq.f32.partialorder %v281_v6, 0.0 }
 0x305   :  { %v285_v8 = vsel %vm283_vm8, 1.0, %v281_v6 }
 0x306   :  { %485 = vrcp.f32 %v285_v8 }
 0x30c   :  { %v484_v9 = vpop.eup %483 }
 0x310   :  { %v486_v15 = vpop.eup %485 }
 0x346   :  { %v334_v10 = vpop.f32.mrb[8].mxu0 }
 0x347   :  { %v389_v11 = vmul.f32 %v484_v9, %v334_v10  ;;  %v464_v12 = vpop.f32.mrb[9].mxu0 }
 0x348   :  { %v337_v13 = vpop.f32.mrb[10].mxu0 }
 0x349   :  { %391 = vst.msk [vmem:[#allocation5] sm:$0xff] %vm166_vm2, %v389_v11  ;;  %v465_v14 = vpop.f32.mrb[11].mxu0 }
 0x34a   :  { %v383_v16 = vpop.f32.mrb[8].mxu1 }
 0x34b   :  { %v390_v17 = vmul.f32 %v486_v15, %v383_v16  ;;  %v470_v18 = vpop.f32.mrb[9].mxu1 }
 0x34c   :  { %v386_v19 = vpop.f32.mrb[10].mxu1 }
 0x34d   :  { %392 = vst.msk [vmem:[#allocation5 + $0x8] sm:$0xff] %vm166_vm2, %v390_v17  ;;  %v471_v20 = vpop.f32.mrb[11].mxu1 }
 0x34e   :  { %520 = shalt.err (!%p517_p12)
}
 0x34f   :  { %s521_s13 = scalar_lea.hbm %s681_s6, 256 }
 0x350   :  { %p522_p13 = scmp.ne.s32.totalorder %s681_s6, %s521_s13  ;;  %p525_p0 = scmp.lt.u32.totalorder %s521_s13, %s681_s6 }
 0x352   :  { %p527_p1 = pnand %p525_p0, %p522_p13 }
 0x354   :  { %530 = shalt.err (!%p527_p1)
}
 0x355   :  { %404 = dma.vmem_to_hbm [thread:$0]  %s399_s9, 256, %s681_s6, [#allocation4], %s536_s7, %s536_s7, %s537_s8  }
 0x356   :  { %533 = dma.done.wait [#allocation4], 256  }
 0x357   :  { %534 = vsyncadd [#allocation4], 4294967040 }
 0x358   :  { %408 = vsyncpa [#allocation3], 1 }
 0x359   :  { %409 = vsyncpa [#allocation4], 1 }

</bundles_post_ra>
